<compile_context>
chip_gen: v6e
topology: v6e:2x2x1
jax: 0.10.0
libtpu: 0.0.40
codegen_flags: <defaults>
</compile_context>

<pallas_src>
import functools

import jax
import jax.numpy as jnp
from jax.experimental import pallas as pl
from jax.experimental.pallas import tpu as pltpu


def _round_up(n, m):
    return ((n + m - 1) // m) * m


def _vmem_physical_bytes():
    """Physical VMEM per TensorCore; conservative v7x fallback if unknown."""
    try:
        info = pltpu.get_tpu_info()
        cap = int(getattr(info, "vmem_capacity_bytes", 0))
        if cap > 0:
            return cap
    except Exception:
        pass
    return 64 << 20  # v7x per-TC VMEM (v5e/v6e have 128 MiB)


def prepare_params(weight, bias, param_dtype=None):
    """One-time parameter prep (do this at init, not per call).

    weight: (C, E) PyTorch nn.Linear layout; bias: (C,)
    Returns w_t: (E, C_pad) MXU-native layout, b2: (1, C_pad) f32,
    with C padded up to a multiple of 128 (lane-dense output, zero columns).
    """
    C, E = weight.shape
    C_pad = _round_up(C, 128)
    if C_pad != C:
        weight = jnp.pad(weight, ((0, C_pad - C), (0, 0)))
        bias = jnp.pad(bias, (0, C_pad - C))
    w_t = jnp.asarray(weight.T)              # (E, C_pad): plain (tm,E)x(E,tn)
    b2 = bias.reshape(1, C_pad).astype(jnp.float32)
    if param_dtype is not None:              # e.g. jnp.bfloat16 on v6e/v7x
        w_t = w_t.astype(param_dtype)
    return w_t, b2


def _cls_head_kernel(x_ref, w_ref, b_ref, o_ref):
    # x_ref: (tm, E) CLS rows, w_ref: (E, tn), b_ref: (1, tn) f32, o_ref: (tm, tn)
    acc = jnp.dot(x_ref[...], w_ref[...], preferred_element_type=jnp.float32)
    o_ref[...] = (acc + b_ref[...]).astype(o_ref.dtype)


def _plan_tiles(B, E, C_pad, in_item, out_item, budget):
    """Pick (tm, tn) under the VMEM budget, preferring a fully-resident W."""

    def fits(tm, tn):
        # double-buffered x, W, bias blocks + double-buffered output block
        req = 2 * ((tm * E + E * tn + tn) * in_item + tm * tn * out_item)
        return req <= budget

    if B >= 8:
        tms = [c for c in (1024, 512, 256, 128, 64, 32, 16, 8) if c <= B]
    else:
        tms = [B]  # full-extent block is always layout-legal

    # Case 1: whole padded weight resident -> 1-D grid over B only.
    for tm in tms:
        if fits(tm, C_pad):
            # v7x has 2 TCs: with nc == 1, keep >= 2 B tiles when batch allows.
            if pl.cdiv(B, tm) < 2 and B >= 16:
                tm_half = max(8, ((B // 2) // 8) * 8)
                if fits(tm_half, C_pad):
                    tm = tm_half
            return tm, C_pad

    # Case 2: tile the class dim too (largest tn that fits, then largest tm).
    for tn in (1024, 512, 256, 128):
        if C_pad % tn:
            continue
        for tm in tms:
            if fits(tm, tn):
                return tm, tn
    return tms[-1], 128


def classification_head(x, w_t, b2, *, n_classes):
    """x: (B, S, E); w_t: (E, C_pad); b2: (1, C_pad) -> (B, n_classes).

    Equivalent to nn.Linear(E, n_classes)(x[:, 0]) with params prepared by
    `prepare_params`.
    """
    B, S, E = x.shape
    E_w, C_pad = w_t.shape
    assert E_w == E and C_pad % 128 == 0 and n_classes <= C_pad

    # CLS selection in the wrapper: contiguous (B, E) slab -> dense DMA tiles.
    x_cls = x[:, 0]
    if x_cls.dtype != w_t.dtype:
        x_cls = x_cls.astype(w_t.dtype)

    in_item = jnp.dtype(w_t.dtype).itemsize
    out_item = jnp.dtype(x.dtype).itemsize
    phys_vmem = _vmem_physical_bytes()
    budget = int(phys_vmem * 0.6)

    tm, tn = _plan_tiles(B, E, C_pad, in_item, out_item, budget)
    nb = pl.cdiv(B, tm)          # ragged last B tile: Pallas masks OOB stores
    nc = C_pad // tn

    if nc == 1:
        # Whole weight resident across the grid: minimum HBM traffic.
        grid = (nb,)
        in_specs = [
            pl.BlockSpec((tm, E), lambda ib: (ib, 0)),
            pl.BlockSpec((E, C_pad), lambda ib: (0, 0)),
            pl.BlockSpec((1, C_pad), lambda ib: (0, 0)),
        ]
        out_specs = pl.BlockSpec((tm, C_pad), lambda ib: (ib, 0))
        dim_sem = ("parallel",)
    else:
        # Choose grid order by which operand is cheaper to re-stream from HBM.
        x_restream = nc * B * E        # C-outer/B-inner: x re-read per C tile
        w_restream = nb * C_pad * E    # B-outer/C-inner: W re-read per B tile
        if x_restream <= w_restream:
            grid = (nc, nb)            # W resident across all B tiles of a C tile
            in_specs = [
                pl.BlockSpec((tm, E), lambda jc, ib: (ib, 0)),
                pl.BlockSpec((E, tn), lambda jc, ib: (0, jc)),
                pl.BlockSpec((1, tn), lambda jc, ib: (0, jc)),
            ]
            out_specs = pl.BlockSpec((tm, tn), lambda jc, ib: (ib, jc))
        else:
            grid = (nb, nc)            # x resident across all C tiles of a B tile
            in_specs = [
                pl.BlockSpec((tm, E), lambda ib, jc: (ib, 0)),
                pl.BlockSpec((E, tn), lambda ib, jc: (0, jc)),
                pl.BlockSpec((1, tn), lambda ib, jc: (0, jc)),
            ]
            out_specs = pl.BlockSpec((tm, tn), lambda ib, jc: (ib, jc))
        dim_sem = ("parallel", "parallel")

    req = 2 * ((tm * E + E * tn + tn) * in_item + tm * tn * out_item)
    vmem_limit = int(min(phys_vmem, max(2 * req, 32 << 20)))

    cost = pl.CostEstimate(
        flops=2 * B * E * C_pad,
        transcendentals=0,
        bytes_accessed=(B * E + E * C_pad + C_pad) * in_item
        + B * C_pad * out_item,
    )

    out = pl.pallas_call(
        _cls_head_kernel,
        out_shape=jax.ShapeDtypeStruct((B, C_pad), x.dtype),
        grid=grid,
        in_specs=in_specs,
        out_specs=out_specs,
        compiler_params=pltpu.CompilerParams(
            dimension_semantics=dim_sem,
            vmem_limit_bytes=vmem_limit,
        ),
        cost_estimate=cost,
    )(x_cls, w_t, b2)

    return out[:, :n_classes] if C_pad != n_classes else out


def _reference(x, weight, bias):
    return x[:, 0] @ weight.T + bias


if __name__ == "__main__":
    # Small shapes consistent with the module: batch=2, seq=8, embed_dim=32,
    # n_classes=10.  (B=2 < 8 also exercises the full-extent tiny-batch tile.)
    B, S, E, C = 2, 8, 32, 10

    key = jax.random.PRNGKey(0)
    kx, kw, kb = jax.random.split(key, 3)

    x = jax.random.normal(kx, (B, S, E), dtype=jnp.float32)
    bound = 1.0 / (E ** 0.5)
    weight = jax.random.uniform(kw, (C, E), minval=-bound, maxval=bound,
                                dtype=jnp.float32)
    bias = jax.random.uniform(kb, (C,), minval=-bound, maxval=bound,
                              dtype=jnp.float32)

    # One-time parameter prep (pad + transpose at "init", not per call).
    # TODO(synk): pass param_dtype=jnp.bfloat16 here for v6e/v7x production.
    w_t, b2 = prepare_params(weight, bias)

    head = jax.jit(functools.partial(classification_head, n_classes=C))
    out = jax.block_until_ready(head(x, w_t, b2))

    ref = _reference(x, weight, bias)
    assert out.shape == (B, C)
    assert jnp.allclose(out, ref, atol=1e-5, rtol=1e-5), "mismatch vs reference"

    print("KERNEL_OK")
</pallas_src>

<mosaic_0001>
module attributes {stable_mosaic.version = 11 : i64} {
  func.func @_cls_head_kernel(%arg0: i32, %arg1: memref<2x32xf32, #tpu.memory_space<vmem>>, %arg2: memref<32x128xf32, #tpu.memory_space<vmem>>, %arg3: memref<1x128xf32, #tpu.memory_space<vmem>>, %arg4: memref<2x128xf32, #tpu.memory_space<vmem>>) attributes {dimension_semantics = [#tpu.dimension_semantics<parallel>], iteration_bounds = array<i64: 1>, scalar_prefetch = 0 : i64, scratch_operands = 0 : i64, tpu.core_type = #tpu.core_type<tc>, window_params = [{transform_indices = @transform_0, window_bounds = array<i64: 2, 32>}, {pipeline_mode = #tpu.pipeline_mode<synchronous>, transform_indices = @transform_1, window_bounds = array<i64: 32, 128>}, {pipeline_mode = #tpu.pipeline_mode<synchronous>, transform_indices = @transform_2, window_bounds = array<i64: 1, 128>}, {transform_indices = @transform_3, window_bounds = array<i64: 2, 128>}]} {
    %c0 = arith.constant 0 : index
    %c0_0 = arith.constant 0 : index
    %0 = vector.load %arg1[%c0, %c0_0] : memref<2x32xf32, #tpu.memory_space<vmem>>, vector<2x32xf32>
    %c0_1 = arith.constant 0 : index
    %c0_2 = arith.constant 0 : index
    %1 = vector.load %arg2[%c0_1, %c0_2] : memref<32x128xf32, #tpu.memory_space<vmem>>, vector<32x128xf32>
    %cst = arith.constant dense<0.000000e+00> : vector<2x128xf32>
    %2 = tpu.matmul %0, %1, %cst {dimension_numbers = #tpu.dot_dimension_numbers<[1], [0], [0], [1], [0, 0, 1, 1], [], []>} : vector<2x32xf32>, vector<32x128xf32>, vector<2x128xf32> -> vector<2x128xf32>
    %c0_3 = arith.constant 0 : index
    %c0_4 = arith.constant 0 : index
    %3 = vector.load %arg3[%c0_3, %c0_4] : memref<1x128xf32, #tpu.memory_space<vmem>>, vector<1x128xf32>
    %4 = vector.broadcast %3 : vector<1x128xf32> to vector<2x128xf32>
    %5 = arith.addf %2, %4 : vector<2x128xf32>
    %c0_5 = arith.constant 0 : index
    %c0_6 = arith.constant 0 : index
    %6 = vector.load %arg4[%c0_5, %c0_6] : memref<2x128xf32, #tpu.memory_space<vmem>>, vector<2x128xf32>
    tpu.vector_store %arg4[%c0_5, %c0_6], %5 {strides = array<i32>} : memref<2x128xf32, #tpu.memory_space<vmem>>, vector<2x128xf32>,
    return
  }
  func.func @transform_0(%arg0: i32) -> (i32, i32) {
    %c0_i32 = arith.constant 0 : i32
    %c0_i32_0 = arith.constant 0 : i32
    return %arg0, %c0_i32 : i32, i32
  }
  func.func @transform_1(%arg0: i32) -> (i32, i32) {
    %c0_i32 = arith.constant 0 : i32
    %c0_i32_0 = arith.constant 0 : i32
    %c0_i32_1 = arith.constant 0 : i32
    return %c0_i32, %c0_i32_0 : i32, i32
  }
  func.func @transform_2(%arg0: i32) -> (i32, i32) {
    %c0_i32 = arith.constant 0 : i32
    %c0_i32_0 = arith.constant 0 : i32
    %c0_i32_1 = arith.constant 0 : i32
    return %c0_i32, %c0_i32_0 : i32, i32
  }
  func.func @transform_3(%arg0: i32) -> (i32, i32) {
    %c0_i32 = arith.constant 0 : i32
    %c0_i32_0 = arith.constant 0 : i32
    return %arg0, %c0_i32 : i32, i32
  }
}

</mosaic_0001>

<bundles_post_ra>
// kernel: classification_head.1
= control target key start
LH: loop header
LB: loop body
LE: loop exit
PB: predicated region body
PF: predicated region fallthrough
CT: control target
= control target key end

     0   :  { %8 = vsyncpa [#allocation3], 0  ;;  %s237_s0 = inlined_call_operand.vmem [shape: f32[2,32], index: 0, kind: input, shape index: {}]   ;;  %s238_s1 = inlined_call_operand.hbm [shape: f32[32,128], index: 1, kind: input, shape index: {}]   ;;  %s239_s2 = inlined_call_operand.vmem [shape: f32[1,128], index: 2, kind: input, shape index: {}]   ;;  %s240_s3 = inlined_call_operand.hbm [shape: f32[2,128], index: 3, kind: output, shape index: {}]  }
   0x1   :  { %9 = vsyncpa [#allocation4], 0  ;;  %s199_s12 = smov [#allocation2]  }
   0x2   :  { %s17_s13 = sshll.u32 %s199_s12, 4  ;;  %s18_s13 = int_to_ptr.vmem [resolvable:$true] %s17_s13 }
   0x3   :  { %s163_s14 = scalar_lea.vmem %s18_s13, 512  ;;  %p168_p1 = scmp.lt.s32.totalorder %s18_s13, %s18_s13 }
   0x4   :  { %p164_p0 = scmp.ne.s32.totalorder %s18_s13, %s163_s14  ;;  %p169_p2 = scmp.lt.s32.totalorder %s163_s14, %s163_s14 }
   0x6   :  { %p170_p3 = por %p169_p2, %p168_p1 }
   0x8   :  { %p171_p4 = pnand %p170_p3, %p164_p0 }
   0xa   :  { %174 = shalt.err (!%p171_p4)
}
   0xb   :  { %s200_s15 = smov 128   ;;  %s201_s16 = smov 8  }
   0xc   :  { %23 = dma.hbm_to_vmem [thread:$0]  %s238_s1, 512, %s18_s13, [#allocation3], %s200_s15, %s200_s15, %s201_s16  }
   0xd   :  { %195 = dma.done.wait [#allocation3], 512  }
   0xe   :  { %196 = vsyncadd [#allocation3], 4294966784  ;;  %v202_v0 = vmov 0.0   ;;  %vm203_vm0 = vmmov 0   ;;  %v33_v1 = vld [vmem:[#allocation2 + $0x18] sm:$0xff]  ;;  %v32_v2 = vld [vmem:[#allocation2 + $0x10] sm:$0xff] }
   0xf   :  { %138 = vmatprep.subr.mxu0 %v202_v0  ;;  %146 = vmatprep.mubr.msk.f32.mxu0 %vm203_vm0, %v202_v0  ;;  %v31_v3 = vld [vmem:[#allocation2 + $0x8] sm:$0xff]  ;;  %v30_v4 = vld [vmem:[#allocation2] sm:$0xff]  ;;  %vm41_vm1 = vcmask 261120   ;;  %s204_s22 = smov [#allocation5]  }
  0x10   :  { %139 = vmatpush3.msra.mxu0 %v33_v1  ;;  %v29_v5 = vld [vmem:[%s237_s0] sm:$0x3]  ;;  %s122_s23 = sshll.u32 %s204_s22, 4  ;;  %s123_s23 = int_to_ptr.vmem [resolvable:$true] %s122_s23 }
  0x11   :  { %140 = vmatprep.subr.mxu0 %v202_v0  ;;  %v131_v6 = vld [vmem:[%s239_s2] ss:$0 sm:$0xff]  ;;  %s175_s24 = scalar_lea.vmem %s123_s23, 32  ;;  %p180_p6 = scmp.lt.s32.totalorder %s123_s23, %s123_s23 }
  0x12   :  { %141 = vmatpush3.msra.mxu0 %v32_v2  ;;  %p176_p5 = scmp.ne.s32.totalorder %s123_s23, %s175_s24  ;;  %p181_p7 = scmp.lt.s32.totalorder %s175_s24, %s175_s24 }
  0x13   :  { %142 = vmatprep.subr.mxu0 %v202_v0 }
  0x14   :  { %143 = vmatpush3.msra.mxu0 %v31_v3  ;;  %p182_p8 = por %p181_p7, %p180_p6 }
  0x15   :  { %144 = vmatprep.subr.mxu0 %v202_v0 }
  0x16   :  { %145 = vmatpush3.msra.mxu0 %v30_v4  ;;  %p183_p9 = pnand %p182_p8, %p176_p5 }
  0x17   :  { %147 = vmatmul.mubr.msk.f32.vlgmr.msra.gmra.mxu0 %vm41_vm1, %v29_v5 }
  0xd7   :  { %v111_v7 = vpop.f32.mrf.mxu0 }
  0xd8   :  { %v112_v8 = vadd.f32 %v131_v6, %v111_v7 }
  0xd9   :  { %v148_v9 = vpop.f32.mrf.mxu0 }
  0xda   :  { %115 = vst [vmem:[#allocation5] sm:$0x3] %v112_v8 }
  0xdb   :  { %186 = shalt.err (!%p183_p9)
}
  0xdc   :  { %125 = dma.vmem_to_hbm [thread:$0]  %s123_s23, 32, %s240_s3, [#allocation4]  }
  0xdd   :  { %197 = dma.done.wait [#allocation4], 32  }
  0xde   :  { %198 = vsyncadd [#allocation4], 4294967264 }
  0xdf   :  { %129 = vsyncpa [#allocation3], 1 }
  0xe0   :  { %130 = vsyncpa [#allocation4], 1 }

</bundles_post_ra>
